<compile_context>
chip_gen: v5e
topology: v5e:2x2
jax: 0.10.0
libtpu: 0.0.40
codegen_flags: <defaults>
</compile_context>

<pallas_src>
import functools
import math

import jax
import jax.numpy as jnp
import numpy as np
from jax.experimental import pallas as pl
from jax.experimental.pallas import tpu as pltpu

DISCOUNT = 0.99

STATE_DIM = 3
ACTION_DIM = 1
HIDDEN = 32
SA_DIM = STATE_DIM + ACTION_DIM          # 4
LOG_DISCOUNT = math.log(DISCOUNT)


def _round_up(x, m):
    return ((x + m - 1) // m) * m


def time_critic_kernel(x_ref, wpack_ref, w2t_ref, b3_ref, out_ref):
    """One batch tile, transposed layout (features on sublanes, batch on lanes).

    x_ref     : (5, TB)   rows 0..3 = [state, action]^T, row 4 = time
    wpack_ref : (32, 8)   cols 0..3 = W1[:4]^T, col 4 = W1[4]^T (scale col),
                          col 5 = b1, col 6 = b2, col 7 = w3
    w2t_ref   : (32, 32)  = W2^T
    b3_ref    : (1, 1)
    out_ref   : (1, TB)   lane-dense output block
    """
    # scale_factor = 1 - DISCOUNT ** time  (EUP exp; DISCOUNT > 0 so exp/log matches pow
    # to within ~1 ulp in f32 — covered by the test tolerance).
    t_row = x_ref[SA_DIM:SA_DIM + 1, :]                                   # (1, TB)
    scale = 1.0 - jnp.exp(t_row * jnp.float32(LOG_DISCOUNT))              # (1, TB)

    wp = wpack_ref[...]                                                   # (32, 8)

    # Layer 1: K=4 + folded scale column -> 5 VPU broadcast MACs (no MXU).
    h1 = wp[:, 4:5] * scale + wp[:, 5:6]                                  # (32, TB)
    for k in range(SA_DIM):                                               # static unroll
        h1 = h1 + wp[:, k:k + 1] * x_ref[k:k + 1, :]
    h1 = jnp.tanh(h1)

    # Layer 2: the only MXU matmul, (32,32) x (32,TB), f32 accumulate.
    h2 = jnp.dot(w2t_ref[...], h1, preferred_element_type=jnp.float32)    # (32, TB)
    h2 = jnp.tanh(h2 + wp[:, 6:7])

    # Layer 3 (N=1): VPU multiply + sublane reduce (XLU), result stays lane-dense.
    v = jnp.sum(h2 * wp[:, 7:8], axis=0, keepdims=True) + b3_ref[...]     # (1, TB)

    out_ref[...] = v * scale


@functools.partial(jax.jit, static_argnames=("tb_max",))
def time_critic_forward(state, action, time, params, *, tb_max=512):
    """state: (B, 3) f32, action: (B, 1) f32, time: (B, 1) f32 -> (B,) f32."""
    w1, b1, w2, b2, w3, b3 = params
    B = state.shape[0]

    # Pack activations once: (5, B) = [state; action; time]^T (batch on lanes).
    xT = jnp.concatenate([state, action, time], axis=1).T.astype(jnp.float32)

    # Pack all small per-feature vectors into one resident (32, 8) VMEM tile.
    wpack = jnp.concatenate(
        [w1[:SA_DIM].T,                       # (32, 4)  W1 feature columns
         w1[SA_DIM:].T,                       # (32, 1)  W1 scale column
         b1.reshape(HIDDEN, 1),
         b2.reshape(HIDDEN, 1),
         w3.reshape(HIDDEN, 1)],
        axis=1).astype(jnp.float32)           # (32, 8)
    w2t = w2.T.astype(jnp.float32)            # (32, 32)
    b3m = b3.reshape(1, 1).astype(jnp.float32)

    # Lane-dense batch tile: multiple of 128, <= tb_max; pad B up to a tile multiple.
    tb = min(tb_max, _round_up(B, 128))
    Bp = _round_up(B, tb)
    if Bp != B:
        xT = jnp.pad(xT, ((0, 0), (0, Bp - B)))   # padded cols: time=0 -> scale=0, harmless

    out = pl.pallas_call(
        time_critic_kernel,
        out_shape=jax.ShapeDtypeStruct((1, Bp), jnp.float32),
        grid=(Bp // tb,),
        in_specs=[
            pl.BlockSpec((5, tb), lambda i: (0, i)),              # activations: streamed
            pl.BlockSpec((HIDDEN, 8), lambda i: (0, 0)),          # weights: resident
            pl.BlockSpec((HIDDEN, HIDDEN), lambda i: (0, 0)),     # W2^T: resident
            pl.BlockSpec((1, 1), lambda i: (0, 0)),               # b3: resident
        ],
        out_specs=pl.BlockSpec((1, tb), lambda i: (0, i)),        # lane-dense output
        compiler_params=pltpu.CompilerParams(
            dimension_semantics=("parallel",)),
    )(xT, wpack, w2t, b3m)

    return out[0, :B]                                             # .squeeze(dim=1)


def init_params(key):
    """Deterministic init matching nn.Linear default U(-1/sqrt(fan_in), 1/sqrt(fan_in))."""
    in_dim = SA_DIM + 1
    ks = jax.random.split(key, 6)

    def lin(kw, kb, fan_in, fan_out):
        bound = 1.0 / math.sqrt(fan_in)
        w = jax.random.uniform(kw, (fan_in, fan_out), jnp.float32, -bound, bound)
        b = jax.random.uniform(kb, (1, fan_out), jnp.float32, -bound, bound)
        return w, b

    w1, b1 = lin(ks[0], ks[1], in_dim, HIDDEN)
    w2, b2 = lin(ks[2], ks[3], HIDDEN, HIDDEN)
    w3, b3 = lin(ks[4], ks[5], HIDDEN, 1)
    return (w1, b1, w2, b2, w3, b3)


def time_critic_ref(state, action, time, params):
    """Pure-JAX reference of the PyTorch forward (state_action=True, layer_norm=False)."""
    w1, b1, w2, b2, w3, b3 = params
    scale = (1.0 - DISCOUNT ** time).astype(jnp.float32)
    x = jnp.concatenate([state, action, scale], axis=1)
    h = jnp.tanh(x @ w1 + b1)
    h = jnp.tanh(h @ w2 + b2)
    v = (h @ w3 + b3) * scale
    return v[:, 0]


if __name__ == "__main__":
    key = jax.random.PRNGKey(0)
    kp, ks, ka, kt = jax.random.split(key, 4)

    params = init_params(kp)

    # Small demo shapes consistent with the module: batch=8, state_dim=3, action_dim=1, hidden=32.
    B = 8
    state = jax.random.normal(ks, (B, STATE_DIM), jnp.float32)
    action = jax.random.normal(ka, (B, ACTION_DIM), jnp.float32)
    time = jax.random.randint(kt, (B, 1), 0, 200).astype(jnp.float32)

    out = jax.block_until_ready(time_critic_forward(state, action, time, params))
    ref = time_critic_ref(state, action, time, params)
    np.testing.assert_allclose(np.asarray(out), np.asarray(ref), rtol=1e-5, atol=1e-5)

    # Also exercise the batch-tiled grid + lane-padding path (multiple 512-wide tiles).
    k2 = jax.random.split(key, 3)
    B2 = 1000
    state2 = jax.random.normal(k2[0], (B2, STATE_DIM), jnp.float32)
    action2 = jax.random.normal(k2[1], (B2, ACTION_DIM), jnp.float32)
    time2 = jax.random.randint(k2[2], (B2, 1), 0, 200).astype(jnp.float32)
    out2 = jax.block_until_ready(time_critic_forward(state2, action2, time2, params))
    ref2 = time_critic_ref(state2, action2, time2, params)
    np.testing.assert_allclose(np.asarray(out2), np.asarray(ref2), rtol=1e-5, atol=1e-5)

    print("KERNEL_OK")
</pallas_src>

<mosaic_0001>
module attributes {stable_mosaic.version = 11 : i64} {
  func.func @time_critic_kernel(%arg0: i32, %arg1: memref<5x128xf32, #tpu.memory_space<vmem>>, %arg2: memref<32x8xf32, #tpu.memory_space<vmem>>, %arg3: memref<32x32xf32, #tpu.memory_space<vmem>>, %arg4: memref<1x1xf32, #tpu.memory_space<vmem>>, %arg5: memref<1x128xf32, #tpu.memory_space<vmem>>) attributes {dimension_semantics = [#tpu.dimension_semantics<parallel>], iteration_bounds = array<i64: 1>, scalar_prefetch = 0 : i64, scratch_operands = 0 : i64, tpu.core_type = #tpu.core_type<tc>, window_params = [{transform_indices = @transform_0, window_bounds = array<i64: 5, 128>}, {pipeline_mode = #tpu.pipeline_mode<synchronous>, transform_indices = @transform_1, window_bounds = array<i64: 32, 8>}, {pipeline_mode = #tpu.pipeline_mode<synchronous>, transform_indices = @transform_2, window_bounds = array<i64: 32, 32>}, {pipeline_mode = #tpu.pipeline_mode<synchronous>, transform_indices = @transform_3, window_bounds = array<i64: 1, 1>}, {transform_indices = @transform_4, window_bounds = array<i64: 1, 128>}]} {
    %c4 = arith.constant 4 : index
    %c0 = arith.constant 0 : index
    %0 = vector.load %arg1[%c4, %c0] : memref<5x128xf32, #tpu.memory_space<vmem>>, vector<1x128xf32>
    %cst = arith.constant -0.0100503359 : f32
    %1 = vector.broadcast %cst : f32 to vector<1x128xf32>
    %2 = arith.mulf %0, %1 : vector<1x128xf32>
    %3 = math.exp %2 : vector<1x128xf32>
    %cst_0 = arith.constant 1.000000e+00 : f32
    %4 = vector.broadcast %cst_0 : f32 to vector<1x128xf32>
    %5 = arith.subf %4, %3 : vector<1x128xf32>
    %c0_1 = arith.constant 0 : index
    %c0_2 = arith.constant 0 : index
    %6 = vector.load %arg2[%c0_1, %c0_2] : memref<32x8xf32, #tpu.memory_space<vmem>>, vector<32x8xf32>
    %7 = vector.extract_strided_slice %6 {offsets = [0, 4], sizes = [32, 1], strides = [1, 1]} : vector<32x8xf32> to vector<32x1xf32>
    %8 = vector.broadcast %7 : vector<32x1xf32> to vector<32x128xf32>
    %9 = vector.broadcast %5 : vector<1x128xf32> to vector<32x128xf32>
    %10 = arith.mulf %8, %9 : vector<32x128xf32>
    %11 = vector.extract_strided_slice %6 {offsets = [0, 5], sizes = [32, 1], strides = [1, 1]} : vector<32x8xf32> to vector<32x1xf32>
    %12 = vector.broadcast %11 : vector<32x1xf32> to vector<32x128xf32>
    %13 = arith.addf %10, %12 : vector<32x128xf32>
    %14 = vector.extract_strided_slice %6 {offsets = [0, 0], sizes = [32, 1], strides = [1, 1]} : vector<32x8xf32> to vector<32x1xf32>
    %c0_3 = arith.constant 0 : index
    %c0_4 = arith.constant 0 : index
    %15 = vector.load %arg1[%c0_3, %c0_4] : memref<5x128xf32, #tpu.memory_space<vmem>>, vector<1x128xf32>
    %16 = vector.broadcast %14 : vector<32x1xf32> to vector<32x128xf32>
    %17 = vector.broadcast %15 : vector<1x128xf32> to vector<32x128xf32>
    %18 = arith.mulf %16, %17 : vector<32x128xf32>
    %19 = arith.addf %13, %18 : vector<32x128xf32>
    %20 = vector.extract_strided_slice %6 {offsets = [0, 1], sizes = [32, 1], strides = [1, 1]} : vector<32x8xf32> to vector<32x1xf32>
    %c1 = arith.constant 1 : index
    %c0_5 = arith.constant 0 : index
    %21 = vector.load %arg1[%c1, %c0_5] : memref<5x128xf32, #tpu.memory_space<vmem>>, vector<1x128xf32>
    %22 = vector.broadcast %20 : vector<32x1xf32> to vector<32x128xf32>
    %23 = vector.broadcast %21 : vector<1x128xf32> to vector<32x128xf32>
    %24 = arith.mulf %22, %23 : vector<32x128xf32>
    %25 = arith.addf %19, %24 : vector<32x128xf32>
    %26 = vector.extract_strided_slice %6 {offsets = [0, 2], sizes = [32, 1], strides = [1, 1]} : vector<32x8xf32> to vector<32x1xf32>
    %c2 = arith.constant 2 : index
    %c0_6 = arith.constant 0 : index
    %27 = vector.load %arg1[%c2, %c0_6] : memref<5x128xf32, #tpu.memory_space<vmem>>, vector<1x128xf32>
    %28 = vector.broadcast %26 : vector<32x1xf32> to vector<32x128xf32>
    %29 = vector.broadcast %27 : vector<1x128xf32> to vector<32x128xf32>
    %30 = arith.mulf %28, %29 : vector<32x128xf32>
    %31 = arith.addf %25, %30 : vector<32x128xf32>
    %32 = vector.extract_strided_slice %6 {offsets = [0, 3], sizes = [32, 1], strides = [1, 1]} : vector<32x8xf32> to vector<32x1xf32>
    %c3 = arith.constant 3 : index
    %c0_7 = arith.constant 0 : index
    %33 = vector.load %arg1[%c3, %c0_7] : memref<5x128xf32, #tpu.memory_space<vmem>>, vector<1x128xf32>
    %34 = vector.broadcast %32 : vector<32x1xf32> to vector<32x128xf32>
    %35 = vector.broadcast %33 : vector<1x128xf32> to vector<32x128xf32>
    %36 = arith.mulf %34, %35 : vector<32x128xf32>
    %37 = arith.addf %31, %36 : vector<32x128xf32>
    %38 = math.tanh %37 : vector<32x128xf32>
    %c0_8 = arith.constant 0 : index
    %c0_9 = arith.constant 0 : index
    %39 = vector.load %arg3[%c0_8, %c0_9] : memref<32x32xf32, #tpu.memory_space<vmem>>, vector<32x32xf32>
    %cst_10 = arith.constant dense<0.000000e+00> : vector<32x128xf32>
    %40 = tpu.matmul %39, %38, %cst_10 {dimension_numbers = #tpu.dot_dimension_numbers<[1], [0], [0], [1], [0, 0, 1, 1], [], []>} : vector<32x32xf32>, vector<32x128xf32>, vector<32x128xf32> -> vector<32x128xf32>
    %41 = vector.extract_strided_slice %6 {offsets = [0, 6], sizes = [32, 1], strides = [1, 1]} : vector<32x8xf32> to vector<32x1xf32>
    %42 = vector.broadcast %41 : vector<32x1xf32> to vector<32x128xf32>
    %43 = arith.addf %40, %42 : vector<32x128xf32>
    %44 = math.tanh %43 : vector<32x128xf32>
    %45 = vector.extract_strided_slice %6 {offsets = [0, 7], sizes = [32, 1], strides = [1, 1]} : vector<32x8xf32> to vector<32x1xf32>
    %46 = vector.broadcast %45 : vector<32x1xf32> to vector<32x128xf32>
    %47 = arith.mulf %44, %46 : vector<32x128xf32>
    %cst_11 = arith.constant dense<0.000000e+00> : vector<128xf32>
    %48 = vector.multi_reduction <add>, %47, %cst_11 [0] : vector<32x128xf32> to vector<128xf32>
    %49 = vector.shape_cast %48 : vector<128xf32> to vector<1x128xf32>
    %c0_12 = arith.constant 0 : index
    %c0_13 = arith.constant 0 : index
    %50 = vector.load %arg4[%c0_12, %c0_13] : memref<1x1xf32, #tpu.memory_space<vmem>>, vector<1x1xf32>
    %51 = vector.broadcast %50 : vector<1x1xf32> to vector<1x128xf32>
    %52 = arith.addf %49, %51 : vector<1x128xf32>
    %53 = arith.mulf %52, %5 : vector<1x128xf32>
    %c0_14 = arith.constant 0 : index
    %c0_15 = arith.constant 0 : index
    %54 = vector.load %arg5[%c0_14, %c0_15] : memref<1x128xf32, #tpu.memory_space<vmem>>, vector<1x128xf32>
    tpu.vector_store %arg5[%c0_14, %c0_15], %53 {strides = array<i32>} : memref<1x128xf32, #tpu.memory_space<vmem>>, vector<1x128xf32>,
    return
  }
  func.func @transform_0(%arg0: i32) -> (i32, i32) {
    %c0_i32 = arith.constant 0 : i32
    %c0_i32_0 = arith.constant 0 : i32
    return %c0_i32, %arg0 : i32, i32
  }
  func.func @transform_1(%arg0: i32) -> (i32, i32) {
    %c0_i32 = arith.constant 0 : i32
    %c0_i32_0 = arith.constant 0 : i32
    %c0_i32_1 = arith.constant 0 : i32
    return %c0_i32, %c0_i32_0 : i32, i32
  }
  func.func @transform_2(%arg0: i32) -> (i32, i32) {
    %c0_i32 = arith.constant 0 : i32
    %c0_i32_0 = arith.constant 0 : i32
    %c0_i32_1 = arith.constant 0 : i32
    return %c0_i32, %c0_i32_0 : i32, i32
  }
  func.func @transform_3(%arg0: i32) -> (i32, i32) {
    %c0_i32 = arith.constant 0 : i32
    %c0_i32_0 = arith.constant 0 : i32
    %c0_i32_1 = arith.constant 0 : i32
    return %c0_i32, %c0_i32_0 : i32, i32
  }
  func.func @transform_4(%arg0: i32) -> (i32, i32) {
    %c0_i32 = arith.constant 0 : i32
    %c0_i32_0 = arith.constant 0 : i32
    return %c0_i32, %arg0 : i32, i32
  }
}

</mosaic_0001>

<bundles_post_ra>
// kernel: time_critic_forward.1
= control target key start
LH: loop header
LB: loop body
LE: loop exit
PB: predicated region body
PF: predicated region fallthrough
CT: control target
= control target key end

     0   :  { %v364_v0 = vmov 5   ;;  %v365_v1 = vmov 4   ;;  %v366_v5 = vmov 0   ;;  %v367_v7 = vmov 1   ;;  %s498_s1 = inlined_call_operand.vmem [shape: f32[32,8], index: 1, kind: input, shape index: {}]   ;;  %s499_s0 = inlined_call_operand.vmem [shape: f32[5,128], index: 0, kind: input, shape index: {}]   ;;  %s500_s3 = inlined_call_operand.<no memory space> [shape: f32[1,1], index: 3, kind: input, shape index: {}]   ;;  %s501_s2 = inlined_call_operand.vmem [shape: f32[32,32], index: 2, kind: input, shape index: {}]   ;;  %s502_s4 = inlined_call_operand.vmem [shape: f32[1,128], index: 4, kind: output, shape index: {}]  }
   0x1   :  { %315 = vset.pattern.permute.xlu1 %v364_v0  ;;  %317 = vset.pattern.permute.xlu2 %v365_v1  ;;  %v400_v2 = vld [vmem:[%s498_s1 + $0x18] sm:$0xff]  ;;  %v405_v3 = vld [vmem:[%s498_s1 + $0x8] sm:$0xff]  ;;  %v413_v4 = vld [vmem:[%s498_s1 + $0x10] sm:$0xff]  ;;  %v368_v8 = vmov 2   ;;  %v369_v9 = vmov 3   ;;  %v370_v58 = vmov 6   ;;  %v9_v62 = vstv %s500_s3 }
   0x2   :  { %314 = vset.pattern.permute.xlu0 %v365_v1  ;;  %66 = vperm.xlu1 %315, %v400_v2   ;;  %v423_v6 = vld [vmem:[%s498_s1] sm:$0xff]  ;;  %10 = vst [vmem:[#allocation2] sm:$0x1] %v9_v62  ;;  %vm201_vm0 = vcmask 261120  }
   0x3   :  { %45 = vperm.xlu0 %314, %v400_v2   ;;  %35 = vperm.xlu2 %317, %v405_v3   ;;  %v19_v18 = vld [vmem:[%s499_s0 + $0x4] sm:$0x1]  ;;  %v342_v32 = vld [vmem:[%s499_s0] ss:$0 sm:$0xff]  ;;  %v343_v36 = vld [vmem:[%s499_s0 + $0x1] ss:$0 sm:$0xff] }
   0x4   :  { %v20_v20 = vmul.f32 -0.010050336, %v19_v18  ;;  %v344_v37 = vld [vmem:[%s499_s0 + $0x2] ss:$0 sm:$0xff]  ;;  %v345_v47 = vld [vmem:[%s499_s0 + $0x3] ss:$0 sm:$0xff] }
   0x6   :  { %v21_v22 = vmul.f32 1.442695, %v20_v20 }
   0x8   :  { %346 = vpow2.f32 %v21_v22 }
   0xa   :  { %316 = vset.pattern.permute.xlu1 %v366_v5 }
   0xb   :  { %40 = vperm.xlu0 %314, %v413_v4   ;;  %318 = vset.pattern.permute.xlu2 %v364_v0 }
   0xc   :  { %87 = vperm.xlu1 %316, %v400_v2   ;;  %62 = vperm.xlu2 %318, %v413_v4  }
   0xe   :  { %v450_v26 = vpop.eup %346 }
   0xf   :  { %v23_v29 = vsub.f32 1.0, %v450_v26 }
  0x11   :  { %v48_v31 = vperm.slane %v23_v29, 0 }
  0x13   :  { %319 = vset.pattern.permute.xlu0 %v366_v5 }
  0x14   :  { %320 = vset.pattern.permute.xlu1 %v367_v7  ;;  %83 = vperm.xlu0 %319, %v413_v4  }
  0x15   :  { %321 = vset.pattern.permute.xlu2 %v365_v1  ;;  %113 = vperm.xlu1 %320, %v400_v2  }
  0x16   :  { %30 = vperm.xlu2 %321, %v423_v6  }
  0x1c   :  { %324 = vset.pattern.permute.xlu0 %v367_v7 }
  0x1d   :  { %322 = vset.pattern.permute.xlu1 %v364_v0  ;;  %109 = vperm.xlu0 %324, %v413_v4  }
  0x1e   :  { %323 = vset.pattern.permute.xlu2 %v366_v5  ;;  %58 = vperm.xlu1 %322, %v405_v3  }
  0x1f   :  { %79 = vperm.xlu2 %323, %v405_v3  }
  0x25   :  { %329 = vset.pattern.permute.xlu0 %v368_v8 }
  0x26   :  { %135 = vperm.xlu0 %329, %v413_v4   ;;  %325 = vset.pattern.permute.xlu1 %v368_v8 }
  0x27   :  { %326 = vset.pattern.permute.xlu2 %v364_v0  ;;  %139 = vperm.xlu1 %325, %v400_v2  }
  0x28   :  { %54 = vperm.xlu2 %326, %v423_v6  }
  0x2e   :  { %127 = vperm.xlu0 %329, %v423_v6  }
  0x2f   :  { %327 = vset.pattern.permute.xlu1 %v366_v5 }
  0x30   :  { %328 = vset.pattern.permute.xlu2 %v367_v7  ;;  %75 = vperm.xlu1 %327, %v423_v6  }
  0x31   :  { %105 = vperm.xlu2 %328, %v405_v3  }
  0x36   :  { %334 = vset.pattern.permute.xlu0 %v370_v58 }
  0x37   :  { %186 = vperm.xlu0 %334, %v423_v6  }
  0x38   :  { %330 = vset.pattern.permute.xlu1 %v369_v9 }
  0x39   :  { %101 = vperm.xlu2 %328, %v423_v6   ;;  %165 = vperm.xlu1 %330, %v400_v2  }
  0x41   :  { %332 = vset.pattern.permute.xlu2 %v369_v9  ;;  %331 = vset.pattern.permute.xlu1 %v368_v8 }
  0x42   :  { %161 = vperm.xlu2 %332, %v413_v4   ;;  %131 = vperm.xlu1 %331, %v405_v3  }
  0x4a   :  { %333 = vset.pattern.permute.xlu1 %v369_v9  ;;  %153 = vperm.xlu2 %332, %v423_v6  }
  0x4b   :  { %157 = vperm.xlu1 %333, %v405_v3  }
  0x52   :  { %336 = vset.pattern.permute.xlu2 %v370_v58 }
  0x53   :  { %335 = vset.pattern.permute.xlu1 %v370_v58  ;;  %194 = vperm.xlu2 %336, %v413_v4  }
  0x54   :  { %190 = vperm.xlu1 %335, %v405_v3  }
  0x5c   :  { %198 = vperm.xlu1 %335, %v400_v2  }
  0x5d   :  { %v445_v10 = vpop.permute.xlu2 %35 }
  0x5e   :  { %v50_v0 = vmul.f32 %v48_v31, %v445_v10 }
  0x66   :  { %v63_v11 = vpop.permute.xlu2 %62 }
  0x70   :  { %v31_v13 = vpop.permute.xlu2 %30 }
  0x71   :  { %v49_v59 = vmul.f32 %v48_v31, %v31_v13 }
  0x74   :  { %v67_v12 = vpop.permute.xlu1 %66 }
  0x75   :  { %v46_v14 = vpop.permute.xlu0 %45 }
  0x76   :  { %v52_v34 = vmul.f32 %v48_v31, %v46_v14 }
  0x78   :  { %v72_v43 = vadd.f32 %v67_v12, %v52_v34 }
  0x79   :  { %v80_v16 = vpop.permute.xlu2 %79 }
  0x7a   :  { %v92_v7 = vmul.f32 %v342_v32, %v80_v16 }
  0x7d   :  { %v41_v17 = vpop.permute.xlu0 %40 }
  0x7e   :  { %v88_v15 = vpop.permute.xlu1 %87  ;;  %v51_v33 = vmul.f32 %v48_v31, %v41_v17 }
  0x7f   :  { %v94_v40 = vmul.f32 %v342_v32, %v88_v15  ;;  %v371_v15 = vmov 7  }
  0x80   :  { %v71_v41 = vadd.f32 %v63_v11, %v51_v33  ;;  %338 = vset.pattern.permute.xlu0 %v371_v15  ;;  %337 = vset.pattern.permute.xlu2 %v371_v15  ;;  %v182_v33 = vld [vmem:[%s501_s2 + $0x8] sm:$0xff] }
  0x81   :  { %v98_v49 = vadd.f32 %v94_v40, %v72_v43  ;;  %252 = vperm.xlu0 %338, %v405_v3   ;;  %248 = vperm.xlu2 %337, %v423_v6   ;;  %v276_v3 = vld [vmem:[#allocation2] sm:$0x1] }
  0x82   :  { %v55_v21 = vpop.permute.xlu2 %54  ;;  %339 = vset.pattern.permute.xlu1 %v371_v15 }
  0x83   :  { %v69_v1 = vadd.f32 %v55_v21, %v49_v59  ;;  %256 = vperm.xlu1 %339, %v413_v4   ;;  %v181_v4 = vld [vmem:[%s501_s2] sm:$0xff] }
  0x86   :  { %v84_v23 = vpop.permute.xlu0 %83 }
  0x87   :  { %v114_v19 = vpop.permute.xlu1 %113  ;;  %v93_v35 = vmul.f32 %v342_v32, %v84_v23 }
  0x88   :  { %v120_v45 = vmul.f32 %v343_v36, %v114_v19 }
  0x89   :  { %v97_v44 = vadd.f32 %v93_v35, %v71_v41  ;;  %341 = vset.pattern.permute.xlu0 %v366_v5  ;;  %260 = vperm.xlu2 %337, %v400_v2   ;;  %v183_v2 = vld [vmem:[%s501_s2 + $0x10] sm:$0xff] }
  0x8a   :  { %v124_v52 = vadd.f32 %v120_v45, %v98_v49 }
  0x8b   :  { %v106_v25 = vpop.permute.xlu2 %105  ;;  %340 = vset.pattern.permute.xlu1 %v366_v5  ;;  %v184_v5 = vld [vmem:[%s501_s2 + $0x18] sm:$0xff] }
  0x8c   :  { %v118_v17 = vmul.f32 %v343_v36, %v106_v25  ;;  %279 = vperm.xlu1 %340, %v276_v3  }
  0x8f   :  { %v110_v27 = vpop.permute.xlu0 %109 }
  0x90   :  { %v59_v24 = vpop.permute.xlu1 %58  ;;  %v119_v42 = vmul.f32 %v343_v36, %v110_v27 }
  0x91   :  { %v70_v8 = vadd.f32 %v59_v24, %v50_v0 }
  0x92   :  { %v123_v50 = vadd.f32 %v119_v42, %v97_v44 }
  0x93   :  { %v102_v30 = vpop.permute.xlu2 %101  ;;  %v96_v19 = vadd.f32 %v92_v7, %v70_v8 }
  0x94   :  { %v117_v9 = vmul.f32 %v343_v36, %v102_v30 }
  0x95   :  { %v122_v24 = vadd.f32 %v118_v17, %v96_v19 }
  0x98   :  { %v136_v39 = vpop.permute.xlu0 %135 }
  0x99   :  { %v140_v28 = vpop.permute.xlu1 %139  ;;  %v145_v46 = vmul.f32 %v344_v37, %v136_v39 }
  0x9a   :  { %v146_v51 = vmul.f32 %v344_v37, %v140_v28 }
  0x9b   :  { %v149_v53 = vadd.f32 %v145_v46, %v123_v50 }
  0x9c   :  { %v162_v48 = vpop.permute.xlu2 %161  ;;  %v150_v56 = vadd.f32 %v146_v51, %v124_v52 }
  0x9d   :  { %v171_v54 = vmul.f32 %v345_v47, %v162_v48 }
  0x9f   :  { %v175_v60 = vadd.f32 %v171_v54, %v149_v53 }
  0xa0   :  { %v128_v13 = vpop.permute.xlu0 %127 }
  0xa1   :  { %v143_v10 = vmul.f32 %v344_v37, %v128_v13 }
  0xa2   :  { %v76_v38 = vpop.permute.xlu1 %75 }
  0xa3   :  { %v91_v63 = vmul.f32 %v342_v32, %v76_v38 }
  0xa4   :  { %v154_v16 = vpop.permute.xlu2 %153 }
  0xa5   :  { %v95_v11 = vadd.f32 %v91_v63, %v69_v1  ;;  %v169_v23 = vmul.f32 %v345_v47, %v154_v16 }
  0xa7   :  { %v121_v20 = vadd.f32 %v117_v9, %v95_v11 }
  0xa9   :  { %v147_v22 = vadd.f32 %v143_v10, %v121_v20  ;;  %v187_v36 = vpop.permute.xlu0 %186 }
  0xab   :  { %v166_v55 = vpop.permute.xlu1 %165  ;;  %v173_v30 = vadd.f32 %v169_v23, %v147_v22 }
  0xac   :  { %v172_v57 = vmul.f32 %v345_v47, %v166_v55 }
  0xad   :  { %v195_v35 = vpop.permute.xlu2 %194 }
  0xae   :  { %v176_v61 = vadd.f32 %v172_v57, %v150_v56 }
  0xb0   :  { %348 = vtanh.f32 %v176_v61 }
  0xb1   :  { %350 = vtanh.f32 %v175_v60 }
  0xb4   :  { %v132_v12 = vpop.permute.xlu1 %131 }
  0xb5   :  { %v144_v21 = vmul.f32 %v344_v37, %v132_v12 }
  0xb6   :  { %v349_v14 = vpop.eup %348 }
  0xb7   :  { %226 = vmatpush.msra.mxu0 %v349_v14  ;;  %294 = vmatpush.msra.mxu1 %v349_v14  ;;  %v351_v18 = vpop.eup %350  ;;  %v148_v27 = vadd.f32 %v144_v21, %v122_v24 }
  0xb8   :  { %295 = vmatpush.msra.mxu2 %v349_v14  ;;  %296 = vmatpush.msra.mxu3 %v349_v14 }
  0xb9   :  { %227 = vmatpush.msra.mxu0 %v351_v18  ;;  %297 = vmatpush.msra.mxu1 %v351_v18 }
  0xba   :  { %298 = vmatpush.msra.mxu2 %v351_v18  ;;  %299 = vmatpush.msra.mxu3 %v351_v18 }
  0xbd   :  { %v158_v25 = vpop.permute.xlu1 %157 }
  0xbe   :  { %v170_v28 = vmul.f32 %v345_v47, %v158_v25 }
  0xc0   :  { %v174_v31 = vadd.f32 %v170_v28, %v148_v27 }
  0xc2   :  { %352 = vtanh.f32 %v174_v31 }
  0xc3   :  { %354 = vtanh.f32 %v173_v30 }
  0xc6   :  { %v191_v34 = vpop.permute.xlu1 %190 }
  0xc8   :  { %v353_v32 = vpop.eup %352 }
  0xc9   :  { %228 = vmatpush.msra.mxu0 %v353_v32  ;;  %300 = vmatpush.msra.mxu1 %v353_v32  ;;  %v355_v6 = vpop.eup %354 }
  0xca   :  { %301 = vmatpush.msra.mxu2 %v353_v32  ;;  %302 = vmatpush.msra.mxu3 %v353_v32 }
  0xcb   :  { %229 = vmatpush.msra.mxu0 %v355_v6  ;;  %303 = vmatpush.msra.mxu1 %v355_v6 }
  0xcc   :  { %304 = vmatpush.msra.mxu2 %v355_v6  ;;  %305 = vmatpush.msra.mxu3 %v355_v6 }
  0xcd   :  { %290 = vmatmul.msk.f32.vlgmr.msra.gmra.mxu0 %vm201_vm0, %v181_v4  ;;  %291 = vmatmul.msk.f32.vlgmr.msra.gmra.mxu1 %vm201_vm0, %v182_v33 }
  0xce   :  { %292 = vmatmul.msk.f32.vlgmr.msra.gmra.mxu2 %vm201_vm0, %v183_v2  ;;  %293 = vmatmul.msk.f32.vlgmr.msra.gmra.mxu3 %vm201_vm0, %v184_v5  ;;  %v199_v41 = vpop.permute.xlu1 %198 }
  0xdb   :  { %v249_v44 = vpop.permute.xlu2 %248 }
  0xe3   :  { %v261_v57 = vpop.permute.xlu2 %260 }
  0xf3   :  { %v253_v49 = vpop.permute.xlu0 %252 }
  0xf5   :  { %v257_v52 = vpop.permute.xlu1 %256 }
  0xfe   :  { %v280_v0 = vpop.permute.xlu1 %279 }
  0xff   :  { %v282_v8 = vperm.slane %v280_v0, 0 }
 0x14a   :  { %v231_v37 = vpop.f32.mrf.mxu0  ;;  %v234_v38 = vpop.f32.mrf.mxu1 }
 0x14b   :  { %v232_v39 = vadd.f32 %v231_v37, %v187_v36  ;;  %v235_v40 = vadd.f32 %v234_v38, %v191_v34 }
 0x14d   :  { %356 = vtanh.f32 %v232_v39 }
 0x14e   :  { %358 = vtanh.f32 %v235_v40 }
 0x151   :  { %v237_v42 = vpop.f32.mrf.mxu2  ;;  %v240_v43 = vpop.f32.mrf.mxu3 }
 0x152   :  { %v238_v45 = vadd.f32 %v237_v42, %v195_v35  ;;  %v241_v46 = vadd.f32 %v240_v43, %v199_v41 }
 0x153   :  { %v357_v47 = vpop.eup %356 }
 0x154   :  { %v359_v48 = vpop.eup %358  ;;  %360 = vtanh.f32 %v238_v45  ;;  %v263_v50 = vmul.f32 %v357_v47, %v249_v44 }
 0x155   :  { %362 = vtanh.f32 %v241_v46  ;;  %v264_v51 = vmul.f32 %v359_v48, %v253_v49 }
 0x157   :  { %v267_v55 = vadd.f32 %v264_v51, %v263_v50 }
 0x15a   :  { %v361_v53 = vpop.eup %360 }
 0x15b   :  { %v363_v54 = vpop.eup %362  ;;  %v265_v56 = vmul.f32 %v361_v53, %v257_v52 }
 0x15c   :  { %v266_v58 = vmul.f32 %v363_v54, %v261_v57 }
 0x15d   :  { %v268_v59 = vadd.f32 %v267_v55, %v265_v56 }
 0x15f   :  { %v269_v60 = vadd.f32 %v268_v59, %v266_v58 }
 0x161   :  { %v270_v61 = vrot.slane %v269_v60, 4 }
 0x163   :  { %v271_v62 = vadd.f32 %v270_v61, %v269_v60 }
 0x165   :  { %v272_v63 = vrot.slane %v271_v62, 2 }
 0x167   :  { %v273_v1 = vadd.f32 %v272_v63, %v271_v62 }
 0x169   :  { %v274_v7 = vrot.slane %v273_v1, 1 }
 0x16b   :  { %v275_v9 = vadd.f32 %v274_v7, %v273_v1 }
 0x16d   :  { %v283_v11 = vadd.f32 %v282_v8, %v275_v9 }
 0x16f   :  { %v284_v12 = vmul.f32 %v283_v11, %v23_v29 }
 0x171   :  { %285 = vst [vmem:[%s502_s4] sm:$0x1] %v284_v12 }

</bundles_post_ra>
